<compile_context>
chip_gen: v7x
topology: tpu7x:2x2x1
jax: 0.10.0
libtpu: 0.0.40
codegen_flags: <defaults>
</compile_context>

<pallas_src>
import functools

import jax
import jax.numpy as jnp
from jax.experimental import pallas as pl
from jax.experimental.pallas import tpu as pltpu


# ----------------------------- configuration --------------------------------
MEM_DIM = 32        # memory.mem_dim
NBR_HEADS = 1       # nbr_heads
INPUT_DIM = 64      # input_dim
BATCH = 4
SIMPLIFIED = False  # ReadWriteHeads default path
MATMUL_DTYPE = jnp.float32  # set to jnp.bfloat16 for batched v6e/v7x runs
                            # (relax the 1e-5 tolerance check accordingly)


def head_gate_dim(mem_dim, nbr_heads, simplified):
    d = nbr_heads * mem_dim          # kr
    d += nbr_heads * 1               # betar
    if not simplified:
        d += nbr_heads * 1           # f
        d += nbr_heads * 3           # pi
        d += mem_dim                 # kw
        d += 1                       # betaw
        d += mem_dim                 # erase
        d += mem_dim                 # write
        d += 1                       # ga
        d += 1                       # gw
    else:
        d += mem_dim // 2            # write (simplified)
    return d


GATE_DIM = head_gate_dim(MEM_DIM, NBR_HEADS, SIMPLIFIED)


def _round_up(x, m):
    return ((x + m - 1) // m) * m


# ------------------------------- Pallas kernel -------------------------------
def _heads_kernel(x_ref, w_ref, b_ref, out_ref, *, mem_dim, nbr_heads):
    """y = x @ W + b, then segment-wise activations via whole-tile activations
    combined with static iota column masks; single lane-dense store."""
    H, M = nbr_heads, mem_dim

    y = jnp.dot(x_ref[...], w_ref[...], preferred_element_type=jnp.float32)
    y = y + b_ref[...].astype(jnp.float32)
    Bp, Gp = y.shape

    col = jax.lax.broadcasted_iota(jnp.int32, (Bp, Gp), 1)

    # Segment boundaries (column order of _generate_addressing, simplified=False).
    kr_e = H * M
    betar_e = kr_e + H
    kw_e = betar_e + M
    betaw_e = kw_e + 1
    erase_e = betaw_e + M
    write_e = erase_e + M
    ga_e = write_e + 1
    gw_e = ga_e + 1
    f_e = gw_e + H
    pi_s = f_e
    pi_e = pi_s + 3 * H

    def in_range(lo, hi):
        return (col >= lo) & (col < hi)

    tanh_mask = (in_range(0, kr_e)              # kr
                 | in_range(betar_e, kw_e)      # kw
                 | in_range(erase_e, write_e))  # write
    softplus_mask = in_range(kr_e, betar_e) | in_range(kw_e, betaw_e)   # betar, betaw
    sigmoid_mask = in_range(betaw_e, erase_e) | in_range(write_e, f_e)  # erase, ga, gw, f
    pi_mask = in_range(pi_s, pi_e)

    # ---- shared-exp epilogue (1 exp feeds both sigmoid and softplus) --------
    t = jnp.exp(-jnp.abs(y))                      # EUP pass 1
    inv_1pt = pl.reciprocal(1.0 + t)              # exact (keeps 1e-5 tolerance)
    sigmoid_v = jnp.where(y >= 0.0, inv_1pt, t * inv_1pt)
    softplus_v = jnp.maximum(y, 0.0) + jnp.log1p(t)   # EUP pass 2 (log)
    tanh_v = jnp.tanh(y)                          # EUP pass 3

    # ---- pi: softmax over each head's 3 adjacent lanes ----------------------
    # Stabilizing shift: per-row max over the pi segment.  It is constant
    # within every group, so the softmax result is identical to per-group max
    # subtraction; non-pi lanes are clamped to the shift so exp stays bounded.
    neg_inf = jnp.float32(-jnp.inf)
    m_row = jnp.max(jnp.where(pi_mask, y, neg_inf), axis=-1, keepdims=True)
    e = jnp.exp(jnp.where(pi_mask, y, m_row) - m_row)   # EUP pass 4

    # Static per-lane position-in-group masks (H is tiny, unrolled).
    false_mask = col < 0
    p1, p2 = false_mask, false_mask
    for h in range(H):
        base = pi_s + 3 * h
        p1 = p1 | (col == base + 1)
        p2 = p2 | (col == base + 2)

    # Group sum at the anchor lane (2 forward rolls), broadcast back (2 rolls).
    e_m1 = pltpu.roll(e, shift=Gp - 1, axis=1)    # e[l + 1]
    e_m2 = pltpu.roll(e, shift=Gp - 2, axis=1)    # e[l + 2]
    gsum_anchor = e + e_m1 + e_m2                 # valid at anchor (base) lanes
    gs_p1 = pltpu.roll(gsum_anchor, shift=1, axis=1)   # anchor value at base+1
    gs_p2 = pltpu.roll(gsum_anchor, shift=2, axis=1)   # anchor value at base+2
    gsum_b = jnp.where(p1, gs_p1, jnp.where(p2, gs_p2, gsum_anchor))
    pi_vals = e * pl.reciprocal(gsum_b)           # exact reciprocal

    # ---- whole-tile mask-select, single lane-dense store ---------------------
    act = jnp.where(
        tanh_mask, tanh_v,
        jnp.where(softplus_mask, softplus_v,
                  jnp.where(sigmoid_mask, sigmoid_v,
                            jnp.where(pi_mask, pi_vals, 0.0))))
    out_ref[...] = act.astype(out_ref.dtype)


# ------------------------------ parameter init --------------------------------
def init_params(key, input_dim=INPUT_DIM, gate_dim=GATE_DIM, w_scale=0.001,
                matmul_dtype=MATMUL_DTYPE):
    """Create Linear params and pre-pad them ONCE (hoisted out of per-step path).

    Stand-in for layer_init(nn.Linear(input_dim, head_gate_dim), w_scale=0.001,
    init_type='ortho').
    """
    g_pad = _round_up(gate_dim, 128)
    weight = jax.random.normal(key, (input_dim, gate_dim), jnp.float32) * w_scale
    bias = jnp.zeros((1, gate_dim), jnp.float32)
    w_padded = jnp.pad(weight, ((0, 0), (0, g_pad - gate_dim))).astype(matmul_dtype)
    b_padded = jnp.pad(bias, ((0, 0), (0, g_pad - gate_dim))).astype(jnp.float32)
    return weight, bias, w_padded, b_padded


# ------------------------------ JAX wrapper ----------------------------------
@jax.jit
def read_write_heads_forward(memory_state, ctrl_inputs, w_padded, b_padded):
    """Pallas-backed equivalent of ReadWriteHeads.forward (simplified=False).

    w_padded/b_padded are the pre-padded parameters from init_params()."""
    del memory_state  # unused by the PyTorch forward as well
    B, D = ctrl_inputs.shape
    G_pad = w_padded.shape[1]
    H, M = NBR_HEADS, MEM_DIM

    # Batch tiling: one tile for small batches, 256-row MXU-sized tiles for
    # large ones (grid steps shard across both TensorCores on v7x).
    b_min = _round_up(max(B, 8), 8)
    b_tile = 256 if b_min >= 256 else b_min
    b_pad = _round_up(b_min, b_tile)
    n_tiles = b_pad // b_tile

    x_p = jnp.pad(ctrl_inputs, ((0, b_pad - B), (0, 0))).astype(w_padded.dtype)

    kernel = functools.partial(_heads_kernel, mem_dim=M, nbr_heads=H)

    itemsize = jnp.dtype(w_padded.dtype).itemsize
    cost = pl.CostEstimate(
        flops=2 * b_pad * D * G_pad,
        transcendentals=4 * b_pad * G_pad,
        bytes_accessed=(b_pad * D * itemsize + D * G_pad * itemsize
                        + G_pad * 4 + b_pad * G_pad * 4),
    )

    activated = pl.pallas_call(
        kernel,
        out_shape=jax.ShapeDtypeStruct((b_pad, G_pad), jnp.float32),
        grid=(n_tiles,),
        in_specs=[
            pl.BlockSpec((b_tile, D), lambda i: (i, 0)),
            pl.BlockSpec((D, G_pad), lambda i: (0, 0)),   # resident across grid
            pl.BlockSpec((1, G_pad), lambda i: (0, 0)),   # resident across grid
        ],
        out_specs=pl.BlockSpec((b_tile, G_pad), lambda i: (i, 0)),
        compiler_params=pltpu.CompilerParams(
            dimension_semantics=("parallel",)),
        cost_estimate=cost,
    )(x_p, w_padded, b_padded)

    # TODO(synk): downstream content-addressing (memory_state . kr / kw cosine
    # similarity) could be fused into this kernel, or consume the padded slab
    # directly via static lane ranges, removing the slice fan-out below.

    # -------- glue: slice the activated slab into the output dict ----------
    odict = {}
    s, e = 0, H * M
    odict["kr"] = activated[:B, s:e].reshape(-1, H, M)
    s, e = e, e + H
    odict["betar"] = activated[:B, s:e].reshape(-1, H, 1)
    s, e = e, e + M
    odict["kw"] = activated[:B, s:e].reshape(-1, 1, M)
    s, e = e, e + 1
    odict["betaw"] = activated[:B, s:e].reshape(-1, 1, 1)
    s, e = e, e + M
    odict["erase"] = activated[:B, s:e].reshape(-1, 1, M)
    s, e = e, e + M
    odict["write"] = activated[:B, s:e].reshape(-1, 1, M)
    s, e = e, e + 1
    odict["ga"] = activated[:B, s:e].reshape(-1, 1, 1)
    s, e = e, e + 1
    odict["gw"] = activated[:B, s:e].reshape(-1, 1, 1)
    s, e = e, e + H
    odict["f"] = activated[:B, s:e].reshape(-1, H, 1)
    s, e = e, e + 3 * H
    odict["pi"] = activated[:B, s:e].reshape(-1, H, 3)
    return odict


# ----------------------------- pure-JAX reference ----------------------------
def _reference(ctrl_inputs, weight, bias):
    y = ctrl_inputs @ weight + bias
    H, M = NBR_HEADS, MEM_DIM
    out = {}
    s, e = 0, H * M
    out["kr"] = jnp.tanh(y[:, s:e]).reshape(-1, H, M)
    s, e = e, e + H
    out["betar"] = jax.nn.softplus(y[:, s:e]).reshape(-1, H, 1)
    s, e = e, e + M
    out["kw"] = jnp.tanh(y[:, s:e]).reshape(-1, 1, M)
    s, e = e, e + 1
    out["betaw"] = jax.nn.softplus(y[:, s:e]).reshape(-1, 1, 1)
    s, e = e, e + M
    out["erase"] = jax.nn.sigmoid(y[:, s:e]).reshape(-1, 1, M)
    s, e = e, e + M
    out["write"] = jnp.tanh(y[:, s:e]).reshape(-1, 1, M)
    s, e = e, e + 1
    out["ga"] = jax.nn.sigmoid(y[:, s:e]).reshape(-1, 1, 1)
    s, e = e, e + 1
    out["gw"] = jax.nn.sigmoid(y[:, s:e]).reshape(-1, 1, 1)
    s, e = e, e + H
    out["f"] = jax.nn.sigmoid(y[:, s:e]).reshape(-1, H, 1)
    s, e = e, e + 3 * H
    out["pi"] = jax.nn.softmax(y[:, s:e].reshape(-1, H, 3), axis=-1)
    return out


# ---------------------------------- main -------------------------------------
if __name__ == "__main__":
    key = jax.random.PRNGKey(0)
    k_x, k_m, k_w = jax.random.split(key, 3)

    # Parameters (padded once at init, not per step).
    weight, bias, w_padded, b_padded = init_params(k_w)

    # Example inputs.
    ctrl_inputs = jax.random.normal(k_x, (BATCH, INPUT_DIM), jnp.float32)
    memory_state = jax.random.normal(k_m, (BATCH, 16, MEM_DIM), jnp.float32)

    odict = read_write_heads_forward(memory_state, ctrl_inputs, w_padded, b_padded)
    jax.block_until_ready(odict)

    # Sanity check against a pure-JAX reference (f32 matmul path -> tight tol).
    ref = _reference(ctrl_inputs, weight, bias)
    for k in ref:
        assert odict[k].shape == ref[k].shape, (k, odict[k].shape, ref[k].shape)
        assert jnp.allclose(odict[k], ref[k], atol=1e-5, rtol=1e-5), k

    print("KERNEL_OK")
</pallas_src>

<mosaic_0001>
module attributes {stable_mosaic.version = 11 : i64} {
  func.func @_heads_kernel(%arg0: i32, %arg1: memref<8x64xf32, #tpu.memory_space<vmem>>, %arg2: memref<64x256xf32, #tpu.memory_space<vmem>>, %arg3: memref<1x256xf32, #tpu.memory_space<vmem>>, %arg4: memref<8x256xf32, #tpu.memory_space<vmem>>) attributes {dimension_semantics = [#tpu.dimension_semantics<parallel>], iteration_bounds = array<i64: 1>, scalar_prefetch = 0 : i64, scratch_operands = 0 : i64, tpu.core_type = #tpu.core_type<tc>, window_params = [{transform_indices = @transform_0, window_bounds = array<i64: 8, 64>}, {pipeline_mode = #tpu.pipeline_mode<synchronous>, transform_indices = @transform_1, window_bounds = array<i64: 64, 256>}, {pipeline_mode = #tpu.pipeline_mode<synchronous>, transform_indices = @transform_2, window_bounds = array<i64: 1, 256>}, {transform_indices = @transform_3, window_bounds = array<i64: 8, 256>}]} {
    %c0 = arith.constant 0 : index
    %c0_0 = arith.constant 0 : index
    %0 = vector.load %arg1[%c0, %c0_0] : memref<8x64xf32, #tpu.memory_space<vmem>>, vector<8x64xf32>
    %c0_1 = arith.constant 0 : index
    %c0_2 = arith.constant 0 : index
    %1 = vector.load %arg2[%c0_1, %c0_2] : memref<64x256xf32, #tpu.memory_space<vmem>>, vector<64x256xf32>
    %cst = arith.constant dense<0.000000e+00> : vector<8x256xf32>
    %2 = tpu.matmul %0, %1, %cst {dimension_numbers = #tpu.dot_dimension_numbers<[1], [0], [0], [1], [0, 0, 1, 1], [], []>} : vector<8x64xf32>, vector<64x256xf32>, vector<8x256xf32> -> vector<8x256xf32>
    %c0_3 = arith.constant 0 : index
    %c0_4 = arith.constant 0 : index
    %3 = vector.load %arg3[%c0_3, %c0_4] : memref<1x256xf32, #tpu.memory_space<vmem>>, vector<1x256xf32>
    %4 = vector.broadcast %3 : vector<1x256xf32> to vector<8x256xf32>
    %5 = arith.addf %2, %4 : vector<8x256xf32>
    %6 = tpu.iota {dimensions = array<i32: 1>} : vector<8x256xi32>
    %c0_i32 = arith.constant 0 : i32
    %7 = vector.broadcast %c0_i32 : i32 to vector<8x256xi32>
    %8 = arith.cmpi sge, %6, %7 : vector<8x256xi32>
    %c32_i32 = arith.constant 32 : i32
    %9 = vector.broadcast %c32_i32 : i32 to vector<8x256xi32>
    %10 = arith.cmpi slt, %6, %9 : vector<8x256xi32>
    %11 = arith.andi %8, %10 : vector<8x256xi1>
    %c33_i32 = arith.constant 33 : i32
    %12 = vector.broadcast %c33_i32 : i32 to vector<8x256xi32>
    %13 = arith.cmpi sge, %6, %12 : vector<8x256xi32>
    %c65_i32 = arith.constant 65 : i32
    %14 = vector.broadcast %c65_i32 : i32 to vector<8x256xi32>
    %15 = arith.cmpi slt, %6, %14 : vector<8x256xi32>
    %16 = arith.andi %13, %15 : vector<8x256xi1>
    %17 = arith.ori %11, %16 : vector<8x256xi1>
    %c98_i32 = arith.constant 98 : i32
    %18 = vector.broadcast %c98_i32 : i32 to vector<8x256xi32>
    %19 = arith.cmpi sge, %6, %18 : vector<8x256xi32>
    %c130_i32 = arith.constant 130 : i32
    %20 = vector.broadcast %c130_i32 : i32 to vector<8x256xi32>
    %21 = arith.cmpi slt, %6, %20 : vector<8x256xi32>
    %22 = arith.andi %19, %21 : vector<8x256xi1>
    %23 = arith.ori %17, %22 : vector<8x256xi1>
    %c32_i32_5 = arith.constant 32 : i32
    %24 = vector.broadcast %c32_i32_5 : i32 to vector<8x256xi32>
    %25 = arith.cmpi sge, %6, %24 : vector<8x256xi32>
    %c33_i32_6 = arith.constant 33 : i32
    %26 = vector.broadcast %c33_i32_6 : i32 to vector<8x256xi32>
    %27 = arith.cmpi slt, %6, %26 : vector<8x256xi32>
    %28 = arith.andi %25, %27 : vector<8x256xi1>
    %c65_i32_7 = arith.constant 65 : i32
    %29 = vector.broadcast %c65_i32_7 : i32 to vector<8x256xi32>
    %30 = arith.cmpi sge, %6, %29 : vector<8x256xi32>
    %c66_i32 = arith.constant 66 : i32
    %31 = vector.broadcast %c66_i32 : i32 to vector<8x256xi32>
    %32 = arith.cmpi slt, %6, %31 : vector<8x256xi32>
    %33 = arith.andi %30, %32 : vector<8x256xi1>
    %34 = arith.ori %28, %33 : vector<8x256xi1>
    %c66_i32_8 = arith.constant 66 : i32
    %35 = vector.broadcast %c66_i32_8 : i32 to vector<8x256xi32>
    %36 = arith.cmpi sge, %6, %35 : vector<8x256xi32>
    %c98_i32_9 = arith.constant 98 : i32
    %37 = vector.broadcast %c98_i32_9 : i32 to vector<8x256xi32>
    %38 = arith.cmpi slt, %6, %37 : vector<8x256xi32>
    %39 = arith.andi %36, %38 : vector<8x256xi1>
    %c130_i32_10 = arith.constant 130 : i32
    %40 = vector.broadcast %c130_i32_10 : i32 to vector<8x256xi32>
    %41 = arith.cmpi sge, %6, %40 : vector<8x256xi32>
    %c133_i32 = arith.constant 133 : i32
    %42 = vector.broadcast %c133_i32 : i32 to vector<8x256xi32>
    %43 = arith.cmpi slt, %6, %42 : vector<8x256xi32>
    %44 = arith.andi %41, %43 : vector<8x256xi1>
    %45 = arith.ori %39, %44 : vector<8x256xi1>
    %c133_i32_11 = arith.constant 133 : i32
    %46 = vector.broadcast %c133_i32_11 : i32 to vector<8x256xi32>
    %47 = arith.cmpi sge, %6, %46 : vector<8x256xi32>
    %c136_i32 = arith.constant 136 : i32
    %48 = vector.broadcast %c136_i32 : i32 to vector<8x256xi32>
    %49 = arith.cmpi slt, %6, %48 : vector<8x256xi32>
    %50 = arith.andi %47, %49 : vector<8x256xi1>
    %51 = math.absf %5 : vector<8x256xf32>
    %cst_12 = arith.constant 0.000000e+00 : f32
    %52 = vector.broadcast %cst_12 : f32 to vector<8x256xf32>
    %53 = arith.subf %52, %51 : vector<8x256xf32>
    %54 = math.exp %53 : vector<8x256xf32>
    %cst_13 = arith.constant 1.000000e+00 : f32
    %55 = vector.broadcast %cst_13 : f32 to vector<8x256xf32>
    %56 = arith.addf %55, %54 : vector<8x256xf32>
    %57 = tpu.reciprocal %56 : vector<8x256xf32> -> vector<8x256xf32>
    %cst_14 = arith.constant 0.000000e+00 : f32
    %58 = vector.broadcast %cst_14 : f32 to vector<8x256xf32>
    %59 = arith.cmpf oge, %5, %58 : vector<8x256xf32>
    %60 = arith.mulf %54, %57 : vector<8x256xf32>
    %61 = arith.select %59, %57, %60 : vector<8x256xi1>, vector<8x256xf32>
    %cst_15 = arith.constant 0.000000e+00 : f32
    %62 = vector.broadcast %cst_15 : f32 to vector<8x256xf32>
    %63 = arith.maximumf %5, %62 : vector<8x256xf32>
    %64 = math.log1p %54 : vector<8x256xf32>
    %65 = arith.addf %63, %64 : vector<8x256xf32>
    %66 = math.tanh %5 : vector<8x256xf32>
    %cst_16 = arith.constant 0xFF800000 : f32
    %67 = vector.broadcast %cst_16 : f32 to vector<8x256xf32>
    %68 = arith.select %50, %5, %67 : vector<8x256xi1>, vector<8x256xf32>
    %cst_17 = arith.constant dense<0xFF800000> : vector<8xf32>
    %69 = vector.multi_reduction <maximumf>, %68, %cst_17 [1] : vector<8x256xf32> to vector<8xf32>
    %70 = vector.shape_cast %69 : vector<8xf32> to vector<8x1xf32>
    %71 = vector.shape_cast %70 : vector<8x1xf32> to vector<8x1xf32>
    %72 = vector.broadcast %71 : vector<8x1xf32> to vector<8x256xf32>
    %73 = arith.select %50, %5, %72 : vector<8x256xi1>, vector<8x256xf32>
    %74 = vector.broadcast %70 : vector<8x1xf32> to vector<8x256xf32>
    %75 = arith.subf %73, %74 : vector<8x256xf32>
    %76 = math.exp %75 : vector<8x256xf32>
    %c0_i32_18 = arith.constant 0 : i32
    %77 = vector.broadcast %c0_i32_18 : i32 to vector<8x256xi32>
    %78 = arith.cmpi slt, %6, %77 : vector<8x256xi32>
    %c134_i32 = arith.constant 134 : i32
    %79 = vector.broadcast %c134_i32 : i32 to vector<8x256xi32>
    %80 = arith.cmpi eq, %6, %79 : vector<8x256xi32>
    %81 = arith.ori %78, %80 : vector<8x256xi1>
    %c135_i32 = arith.constant 135 : i32
    %82 = vector.broadcast %c135_i32 : i32 to vector<8x256xi32>
    %83 = arith.cmpi eq, %6, %82 : vector<8x256xi32>
    %84 = arith.ori %78, %83 : vector<8x256xi1>
    %c255_i32 = arith.constant 255 : i32
    %85 = tpu.dynamic_rotate %76 by %c255_i32 dim 1 : vector<8x256xf32>, i32 -> vector<8x256xf32>
    %c254_i32 = arith.constant 254 : i32
    %86 = tpu.dynamic_rotate %76 by %c254_i32 dim 1 : vector<8x256xf32>, i32 -> vector<8x256xf32>
    %87 = arith.addf %76, %85 : vector<8x256xf32>
    %88 = arith.addf %87, %86 : vector<8x256xf32>
    %c1_i32 = arith.constant 1 : i32
    %89 = tpu.dynamic_rotate %88 by %c1_i32 dim 1 : vector<8x256xf32>, i32 -> vector<8x256xf32>
    %c2_i32 = arith.constant 2 : i32
    %90 = tpu.dynamic_rotate %88 by %c2_i32 dim 1 : vector<8x256xf32>, i32 -> vector<8x256xf32>
    %91 = arith.select %84, %90, %88 : vector<8x256xi1>, vector<8x256xf32>
    %92 = arith.select %81, %89, %91 : vector<8x256xi1>, vector<8x256xf32>
    %93 = tpu.reciprocal %92 : vector<8x256xf32> -> vector<8x256xf32>
    %94 = arith.mulf %76, %93 : vector<8x256xf32>
    %cst_19 = arith.constant 0.000000e+00 : f32
    %95 = vector.broadcast %cst_19 : f32 to vector<8x256xf32>
    %96 = arith.select %50, %94, %95 : vector<8x256xi1>, vector<8x256xf32>
    %97 = arith.select %45, %61, %96 : vector<8x256xi1>, vector<8x256xf32>
    %98 = arith.select %34, %65, %97 : vector<8x256xi1>, vector<8x256xf32>
    %99 = arith.select %23, %66, %98 : vector<8x256xi1>, vector<8x256xf32>
    %c0_20 = arith.constant 0 : index
    %c0_21 = arith.constant 0 : index
    %100 = vector.load %arg4[%c0_20, %c0_21] : memref<8x256xf32, #tpu.memory_space<vmem>>, vector<8x256xf32>
    tpu.vector_store %arg4[%c0_20, %c0_21], %99 {strides = array<i32>} : memref<8x256xf32, #tpu.memory_space<vmem>>, vector<8x256xf32>,
    return
  }
  func.func @transform_0(%arg0: i32) -> (i32, i32) {
    %c0_i32 = arith.constant 0 : i32
    %c0_i32_0 = arith.constant 0 : i32
    return %arg0, %c0_i32 : i32, i32
  }
  func.func @transform_1(%arg0: i32) -> (i32, i32) {
    %c0_i32 = arith.constant 0 : i32
    %c0_i32_0 = arith.constant 0 : i32
    %c0_i32_1 = arith.constant 0 : i32
    return %c0_i32, %c0_i32_0 : i32, i32
  }
  func.func @transform_2(%arg0: i32) -> (i32, i32) {
    %c0_i32 = arith.constant 0 : i32
    %c0_i32_0 = arith.constant 0 : i32
    %c0_i32_1 = arith.constant 0 : i32
    return %c0_i32, %c0_i32_0 : i32, i32
  }
  func.func @transform_3(%arg0: i32) -> (i32, i32) {
    %c0_i32 = arith.constant 0 : i32
    %c0_i32_0 = arith.constant 0 : i32
    return %arg0, %c0_i32 : i32, i32
  }
}

</mosaic_0001>

<bundles_post_ra>
// kernel: read_write_heads_forward.1
= control target key start
LH: loop header
LB: loop body
LE: loop exit
PB: predicated region body
PF: predicated region fallthrough
CT: control target
= control target key end

     0   :  { %8 = vsyncpa [#allocation3], 0  ;;  %s380_s12 = smov [#allocation2]   ;;  %s493_s0 = inlined_call_operand.vmem [shape: f32[8,64], index: 0, kind: input, shape index: {}]   ;;  %s494_s1 = inlined_call_operand.hbm [shape: f32[64,256], index: 1, kind: input, shape index: {}]   ;;  %s495_s2 = inlined_call_operand.vmem [shape: f32[1,256], index: 2, kind: input, shape index: {}]   ;;  %s496_s3 = inlined_call_operand.vmem [shape: f32[8,256], index: 3, kind: output, shape index: {}]  }
   0x1   :  { %s16_s13 = sshll.u32 %s380_s12, 4  ;;  %s356_s16 = scalar_lea.hbm %s494_s1, 2048  ;;  %s17_s13 = int_to_ptr.vmem [resolvable:$true] %s16_s13 }
   0x2   :  { %p357_p0 = scmp.ne.s32.totalorder %s494_s1, %s356_s16  ;;  %p360_p1 = scmp.lt.u32.totalorder %s356_s16, %s494_s1 }
   0x4   :  { %p362_p2 = pnand %p360_p1, %p357_p0 }
   0x6   :  { %365 = shalt.err (!%p362_p2)
}
   0x7   :  { %s366_s21 = scalar_lea.vmem %s17_s13, 2048  ;;  %p371_p4 = scmp.lt.s32.totalorder %s17_s13, %s17_s13 }
   0x8   :  { %p367_p3 = scmp.ne.s32.totalorder %s17_s13, %s366_s21  ;;  %p372_p5 = scmp.lt.s32.totalorder %s366_s21, %s366_s21 }
   0xa   :  { %p373_p6 = por %p372_p5, %p371_p4 }
   0xc   :  { %p374_p7 = pnand %p373_p6, %p367_p3 }
   0xe   :  { %377 = shalt.err (!%p374_p7)
}
   0xf   :  { %s381_s22 = smov 256   ;;  %s382_s23 = smov 16  }
  0x10   :  { %22 = dma.hbm_to_vmem [thread:$0]  %s494_s1, 2048, %s17_s13, [#allocation3], %s381_s22, %s381_s22, %s382_s23  }
  0x11   :  { %378 = dma.done.wait [#allocation3], 2048  }
  0x12   :  { %379 = vsyncadd [#allocation3], 4294965248  ;;  %v383_v0 = vmov 0.0   ;;  %v30_v1 = vld [vmem:[#allocation2 + $0x8] sm:$0xff]  ;;  %v32_v2 = vld [vmem:[#allocation2 + $0x18] sm:$0xff]  ;;  %vm57_vm0 = vcmask 523264   ;;  %v47_v26 = vlaneseq }
  0x13   :  { %125 = vmatprep.mubr.f32.mxu0 %v383_v0  ;;  %v29_v3 = vld [vmem:[#allocation2] sm:$0xff]  ;;  %v312_v4 = vpack.c.bf16 %v32_v2, %v30_v1  ;;  %v31_v5 = vld [vmem:[#allocation2 + $0x10] sm:$0xff]  ;;  %v34_v6 = vld [vmem:[#allocation2 + $0x28] sm:$0xff]  ;;  %s384_s29 = smov 126   ;;  %s385_s30 = smov 127  }
  0x14   :  { %v36_v7 = vld [vmem:[#allocation2 + $0x38] sm:$0xff]  ;;  %v314_v8 = vpack.c.bf16 %v31_v5, %v29_v3  ;;  %v33_v10 = vld [vmem:[#allocation2 + $0x20] sm:$0xff]  ;;  %v35_v11 = vld [vmem:[#allocation2 + $0x30] sm:$0xff]  ;;  %v48_v27 = vshrl.u32 %v47_v26, 7  ;;  %v423_v28 = vand.u32 127, %v47_v26  ;;  %s386_s4 = smov 2  }
  0x15   :  { %v316_v9 = vpack.c.bf16 %v36_v7, %v34_v6  ;;  %v38_v12 = vld [vmem:[#allocation2 + $0x48] sm:$0xff]  ;;  %313 = vmatprep.subr.bf16.mxu0 %v312_v4  ;;  %v40_v13 = vld [vmem:[#allocation2 + $0x58] sm:$0xff]  ;;  %v318_v14 = vpack.c.bf16 %v35_v11, %v33_v10  ;;  %v37_v16 = vld [vmem:[#allocation2 + $0x40] sm:$0xff]  ;;  %s387_s5 = smov 1  }
  0x16   :  { %315 = vmatpush1.bf16.msra.mxu0 %v314_v8  ;;  %v320_v15 = vpack.c.bf16 %v40_v13, %v38_v12  ;;  %v39_v17 = vld [vmem:[#allocation2 + $0x50] sm:$0xff]  ;;  %v42_v18 = vld [vmem:[#allocation2 + $0x68] sm:$0xff]  ;;  %v44_v19 = vld [vmem:[#allocation2 + $0x78] sm:$0xff]  ;;  %v49_v29 = vsub.s32 0, %v48_v27  ;;  %v53_v31 = vsub.s32 1, %v48_v27  ;;  %v429_v32 = vadd.s32 128, %v423_v28 }
  0x17   :  { %317 = vmatprep.subr.bf16.mxu0 %v316_v9  ;;  %v322_v20 = vpack.c.bf16 %v39_v17, %v37_v16  ;;  %v324_v21 = vpack.c.bf16 %v44_v19, %v42_v18  ;;  %v41_v22 = vld [vmem:[#allocation2 + $0x60] sm:$0xff]  ;;  %v43_v23 = vld [vmem:[#allocation2 + $0x70] sm:$0xff]  ;;  %vm141_vm4 = vcmp.ge.s32.totalorder %v423_v28, 33  ;;  %vm143_vm5 = vcmp.lt.s32.totalorder %v423_v28, 65 }
  0x18   :  { %v326_v24 = vpack.c.bf16 %v43_v23, %v41_v22  ;;  %v28_v25 = vld [vmem:[%s493_s0] sm:$0xff]  ;;  %vm186_vm1 = vcmp.ge.s32.totalorder %v429_v32, 133  ;;  %vm188_vm2 = vcmp.lt.s32.totalorder %v429_v32, 136  ;;  %vm157_vm6 = vcmp.ge.s32.totalorder %v423_v28, 32  ;;  %vm145_vm10 = vmand %vm141_vm4, %vm143_vm5 }
  0x19   :  { %v45_v30 = vld [vmem:[%s495_s2] sm:$0x3]  ;;  %vm433_vm3 = vmand %vm186_vm1, %vm188_vm2  ;;  %vm159_vm7 = vcmp.lt.s32.totalorder %v423_v28, 33  ;;  %vm163_vm8 = vcmp.ge.s32.totalorder %v423_v28, 65  ;;  %vm165_vm9 = vcmp.lt.s32.totalorder %v423_v28, 66  ;;  %vm171_vm11 = vcmp.ge.s32.totalorder %v423_v28, 66 }
  0x1a   :  { %319 = vmatpush1.bf16.msra.mxu0 %v318_v14  ;;  %v50_v33 = vrot.slane %v45_v30, %v49_v29  ;;  %v54_v34 = vrot.slane %v45_v30, %v53_v31  ;;  %vm173_vm12 = vcmp.lt.s32.totalorder %v423_v28, 98  ;;  %vm137_vm13 = vcmp.lt.s32.totalorder %v423_v28, 32  ;;  %vm451_vm14 = vmand %vm157_vm6, %vm159_vm7 }
  0x1b   :  { %321 = vmatprep.subr.bf16.mxu0 %v320_v15  ;;  %vm455_vm15 = vmand %vm163_vm8, %vm165_vm9  ;;  %vm149_vm2 = vcmp.ge.s32.totalorder %v423_v28, 98  ;;  %vm260_vm8 = vcmp.lt.s32.totalorder %v423_v28, 127  ;;  %vm267_vm9 = vcmp.lt.s32.totalorder %v423_v28, 126 }
  0x1c   :  { %vm147_vm1 = vmor %vm137_vm13, %vm145_vm10  ;;  %vm285_vm10 = vcmp.lt.s32.totalorder %v423_v28, 2  ;;  %vm249_vm13 = vcmp.eq.s32.totalorder %v429_v32, 134 }
  0x1d   :  { %vm169_vm6 = vmor %vm451_vm14, %vm455_vm15  ;;  %vm178_vm14 = vcmp.ge.s32.totalorder %v429_v32, 130  ;;  %vm180_vm15 = vcmp.lt.s32.totalorder %v429_v32, 133 }
  0x1e   :  { %323 = vmatpush1.bf16.msra.mxu0 %v322_v20  ;;  %vm155_vm7 = vmor %vm147_vm1, %vm149_vm2  ;;  %vm152_vm2 = vcmp.lt.s32.totalorder %v429_v32, 130 }
  0x1f   :  { %325 = vmatprep.subr.bf16.mxu0 %v324_v21 }
  0x22   :  { %327 = vmatpush1.bf16.msra.mxu0 %v326_v24 }
  0x25   :  { %311 = vmatmul.mubr.msk.f32.vlgmr.msra.gmra.mrb[0].mxu0 %vm57_vm0, %v28_v25  ;;  %vm459_vm0 = vmand %vm171_vm11, %vm173_vm12  ;;  %vm253_vm11 = vcmp.eq.s32.totalorder %v429_v32, 135  ;;  %vm278_vm12 = vcmp.lt.s32.totalorder %v423_v28, 1 }
  0xf8   :  { %v127_v35 = vpop.f32.mrb[0].mxu0 }
  0xf9   :  { %v128_v36 = vadd.f32 %v127_v35, %v50_v33  ;;  %v129_v37 = vpop.f32.mrb[1].mxu0 }
  0xfa   :  { %v437_v39 = vadd.f32 %v129_v37, %v54_v34 }
  0xfb   :  { %v191_v40 = vand.u32 2147483647, %v128_v36  ;;  %vm203_vm4 = vcmp.ge.f32.partialorder %v128_v36, 0.0  ;;  %v209_v58 = vmax.f32 %v128_v36, 0.0 }
  0xfc   :  { %v234_v41 = vsel %vm433_vm3, %v437_v39, -inf  ;;  %v192_v21 = vand.u32 2147483647, %v437_v39  ;;  %vm204_vm1 = vcmp.ge.f32.partialorder %v437_v39, 0.0 }
  0xfd   :  { %v193_v42 = vsub.f32 0.0, %v191_v40  ;;  %236 = vmax.xlane.f32.xlu0 %v234_v41 }
  0xfe   :  { %v194_v22 = vsub.f32 0.0, %v192_v21 }
  0xff   :  { %v195_v43 = vmul.f32 1.442695, %v193_v42 }
 0x100   :  { %v197_v23 = vmul.f32 1.442695, %v194_v22 }
 0x101   :  { %336 = vpow2.f32 %v195_v43 }
 0x10b   :  { %v337_v44 = vpop.eup %336 }
 0x10c   :  { %v199_v45 = vadd.f32 1.0, %v337_v44  ;;  %v214_v46 = vmul.f32 -0.5, %v337_v44  ;;  %v217_v49 = vand.u32 2147483647, %v337_v44 }
 0x10e   :  { %338 = vrcp.f32 %v199_v45  ;;  %v215_v47 = vadd.f32 1.0, %v214_v46  ;;  %vm218_vm5 = vcmp.lt.f32.partialorder %v217_v49, 0.0004427343 }
 0x10f   :  { %340 = vlog2.f32 %v199_v45 }
 0x110   :  { %342 = vtanh.f32 %v128_v36  ;;  %v216_v56 = vmul.f32 %v337_v44, %v215_v47 }
 0x118   :  { %v339_v50 = vpop.eup %338 }
 0x119   :  { %v341_v52 = vpop.eup %340  ;;  %v205_v54 = vmul.f32 %v339_v50, %v337_v44 }
 0x11a   :  { %v213_v55 = vmul.f32 0.6931472, %v341_v52  ;;  %v343_v62 = vpop.eup %342 }
 0x11b   :  { %v207_v57 = vsel %vm203_vm4, %v339_v50, %v205_v54 }
 0x11c   :  { %v219_v59 = vsel %vm218_vm5, %v216_v56, %v213_v55  ;;  %v298_v60 = vsel %vm459_vm0, %v207_v57, 0.0  ;;  %vm182_vm0 = vmand %vm178_vm14, %vm180_vm15 }
 0x11d   :  { %v229_v61 = vadd.f32 %v219_v59, %v209_v58 }
 0x11f   :  { %v300_v63 = vsel %vm169_vm6, %v229_v61, %v298_v60 }
 0x120   :  { %v302_v0 = vsel %vm155_vm7, %v343_v62, %v300_v63 }
 0x121   :  { %304 = vst [vmem:[%s496_s3] sm:$0xff] %v302_v0 }
 0x18a   :  { %v237_v1 = vpop.xlane.xlu0 %236 }
 0x18b   :  { %v239_v2 = vsel %vm433_vm3, %v437_v39, %v237_v1  ;;  %v240_v3 = vsub.f32 %v237_v1, %v237_v1 }
 0x18c   :  { %v241_v4 = vsub.f32 %v239_v2, %v237_v1 }
 0x18d   :  { %v242_v5 = vmul.f32 1.442695, %v240_v3 }
 0x18e   :  { %v244_v6 = vmul.f32 1.442695, %v241_v4 }
 0x18f   :  { %344 = vpow2.f32 %v242_v5 }
 0x190   :  { %346 = vpow2.f32 %v244_v6 }
 0x191   :  { %348 = vpow2.f32 %v197_v23 }
 0x199   :  { %v345_v7 = vpop.eup %344 }
 0x19a   :  { %263 = vrot.lane.b32.xlu1 %v345_v7, %s384_s29  ;;  %256 = vrot.lane.b32.xlu0 %v345_v7, %s385_s30  ;;  %v347_v8 = vpop.eup %346 }
 0x19b   :  { %v349_v25 = vpop.eup %348 }
 0x19c   :  { %v200_v27 = vadd.f32 1.0, %v349_v25 }
 0x19e   :  { %258 = vrot.lane.b32.xlu1 %v347_v8, %s385_s30  ;;  %350 = vrcp.f32 %v200_v27 }
 0x1a2   :  { %265 = vrot.lane.b32.xlu1 %v347_v8, %s384_s29 }
 0x1a8   :  { %v351_v36 = vpop.eup %350 }
 0x1a9   :  { %v206_v37 = vmul.f32 %v351_v36, %v349_v25 }
 0x1ab   :  { %v208_v28 = vsel %vm204_vm1, %v351_v36, %v206_v37 }
 0x20c   :  { %v264_v9 = vpop.permute.xlu1 %263  ;;  %v257_v10 = vpop.permute.xlu0 %256 }
 0x210   :  { %v259_v11 = vpop.permute.xlu1 %258 }
 0x211   :  { %v261_v12 = vsel %vm260_vm8, %v257_v10, %v259_v11  ;;  %v262_v15 = vsel %vm260_vm8, %v259_v11, %v257_v10 }
 0x212   :  { %v270_v13 = vadd.f32 %v345_v7, %v261_v12  ;;  %v271_v19 = vadd.f32 %v347_v8, %v262_v15 }
 0x214   :  { %v266_v14 = vpop.permute.xlu1 %265 }
 0x215   :  { %v268_v16 = vsel %vm267_vm9, %v264_v9, %v266_v14  ;;  %v269_v18 = vsel %vm267_vm9, %v266_v14, %v264_v9 }
 0x216   :  { %v272_v17 = vadd.f32 %v270_v13, %v268_v16  ;;  %v273_v20 = vadd.f32 %v271_v19, %v269_v18 }
 0x218   :  { %281 = vrot.lane.b32.xlu1 %v272_v17, %s386_s4 }
 0x21c   :  { %283 = vrot.lane.b32.xlu1 %v273_v20, %s386_s4 }
 0x220   :  { %274 = vrot.lane.b32.xlu1 %v272_v17, %s387_s5 }
 0x224   :  { %276 = vrot.lane.b32.xlu1 %v273_v20, %s387_s5 }
 0x28a   :  { %v282_v24 = vpop.permute.xlu1 %281 }
 0x28e   :  { %v284_v26 = vpop.permute.xlu1 %283 }
 0x28f   :  { %v286_v30 = vsel %vm285_vm10, %v282_v24, %v284_v26 }
 0x290   :  { %v289_v33 = vsel %vm253_vm11, %v286_v30, %v273_v20 }
 0x292   :  { %v275_v29 = vpop.permute.xlu1 %274 }
 0x296   :  { %v277_v31 = vpop.permute.xlu1 %276 }
 0x297   :  { %v279_v34 = vsel %vm278_vm12, %v275_v29, %v277_v31 }
 0x298   :  { %v291_v35 = vsel %vm249_vm13, %v279_v34, %v289_v33 }
 0x299   :  { %352 = vrcp.f32 %v291_v35 }
 0x29a   :  { %354 = vtanh.f32 %v437_v39 }
 0x2a3   :  { %v353_v40 = vpop.eup %352 }
 0x2a4   :  { %v295_v41 = vmul.f32 %v353_v40, %v347_v8  ;;  %v355_v43 = vpop.eup %354 }
 0x2a6   :  { %v297_v42 = vsel %vm433_vm3, %v295_v41, 0.0 }
 0x2a7   :  { %v299_v44 = vsel %vm182_vm0, %v208_v28, %v297_v42 }
 0x2a8   :  { %v303_v45 = vsel %vm152_vm2, %v355_v43, %v299_v44 }
 0x2a9   :  { %305 = vst [vmem:[%s496_s3 + $0x8] sm:$0xff] %v303_v45 }
 0x2aa   :  { %310 = vsyncpa [#allocation3], 1 }

</bundles_post_ra>
